<compile_context>
chip_gen: v6e
topology: v6e:2x2x1
jax: 0.10.0
libtpu: 0.0.40
codegen_flags: <defaults>
</compile_context>

<pallas_src>
import math
from functools import partial

import jax
import jax.numpy as jnp
from jax import lax
from jax.experimental import pallas as pl
from jax.experimental.pallas import tpu as pltpu

_INV_SQRT2 = 1.0 / math.sqrt(2.0)
_SQRT_2_OVER_PI = math.sqrt(2.0 / math.pi)


def _round_up(x, m):
    return (x + m - 1) // m * m


def _maybe_pad(a, pads):
    if all(lo == 0 and hi == 0 for lo, hi in pads):
        return a
    return jnp.pad(a, pads)


def ffn_kernel(x_ref, w1_ref, b1_ref, w2_ref, b2_ref, o_ref, *scratch,
               approximate_gelu=False):
    # x_ref:  (tm, E_pad)  compute dtype     w1_ref: (E_pad, th) compute dtype
    # b1_ref: (num_k, th)  f32 (resident)    w2_ref: (th, E_pad) compute dtype
    # b2_ref: (1, E_pad)   f32 (resident)    o_ref:  (tm, E_pad) out dtype
    # scratch: optional (tm, E_pad) f32 accumulator (only when out dtype != f32)
    acc_ref = scratch[0] if scratch else o_ref
    k = pl.program_id(1)

    @pl.when(k == 0)
    def _():
        # Seed the accumulator with b2 so the epilogue is just a cast/store.
        acc_ref[...] = jnp.broadcast_to(b2_ref[...], acc_ref.shape).astype(
            acc_ref.dtype)

    # First linear on the MXU with f32 accumulation, plus this hidden chunk's
    # bias (dynamic sublane slice of the resident b1 block).
    h = jnp.dot(x_ref[...], w1_ref[...], preferred_element_type=jnp.float32)
    h += b1_ref[pl.ds(k, 1), :]

    if approximate_gelu:
        # tanh GELU: one EUP op per element instead of the erf polynomial
        # (slightly different numerics than torch.nn.GELU() default).
        h = 0.5 * h * (1.0 + jnp.tanh(_SQRT_2_OVER_PI * (h + 0.044715 * h * h * h)))
    else:
        # Exact erf GELU in f32 -- matches torch.nn.GELU() default.
        h = 0.5 * h * (1.0 + lax.erf(h * _INV_SQRT2))

    # Second linear (MXU): accumulate this hidden slice's partial contribution.
    acc_ref[...] += jnp.dot(h.astype(w2_ref.dtype), w2_ref[...],
                            preferred_element_type=jnp.float32)

    if scratch:
        @pl.when(k == pl.num_programs(1) - 1)
        def _():
            o_ref[...] = acc_ref[...].astype(o_ref.dtype)


def feed_forward(x, w1, b1, w2, b2, *, tm=512, th=512,
                 compute_dtype=jnp.bfloat16, approximate_gelu=False):
    """x: (B, S, E). w1: (E, H), b1: (H,), w2: (H, E), b2: (E,) -> (B, S, E).

    Grid: (row tiles ["parallel"], hidden slabs ["arbitrary"]).  Spend VMEM on
    `tm` (halves weight re-streaming each time it doubles); `th` only amortizes
    the ~0.35 us per-grid-step overhead.
    """
    B, S, E = x.shape
    E_in, H = w1.shape
    assert E_in == E and w2.shape == (H, E) and b1.shape == (H,) and b2.shape == (E,)

    tokens = B * S
    out_dtype = x.dtype
    cbytes = jnp.dtype(compute_dtype).itemsize
    obytes = jnp.dtype(out_dtype).itemsize
    use_scratch = out_dtype != jnp.float32

    E_pad = _round_up(E, 128)

    # Row tile: multiple of 8; ensure >= 2 tiles on the "parallel" axis when
    # there are enough rows so both v7x TensorCores get work.
    tm_eff = max(8, min(tm, _round_up(tokens, 8)))
    if tokens > 8 and _round_up(tokens, tm_eff) // tm_eff < 2:
        tm_eff = _round_up((tokens + 1) // 2, 8)
    th_eff = max(128, min(th, _round_up(H, 128)))

    # Physical VMEM per core (v5e/v6e: 128 MiB, v7x: 64 MiB); fall back to the
    # conservative v7x value if the query is unavailable.
    try:
        vmem_cap = int(pltpu.get_tpu_info().vmem_capacity_bytes)
    except Exception:
        vmem_cap = 64 << 20

    def footprint(tm_, th_):
        h_pad_ = _round_up(_round_up(H, 128), th_)
        return (2 * tm_ * E_pad * cbytes          # x tile (double-buffered)
                + 2 * E_pad * th_ * cbytes        # W1 slab
                + 2 * th_ * E_pad * cbytes        # W2 slab
                + 2 * h_pad_ * 4                  # b1 (resident, conservative 2x)
                + 2 * E_pad * 4                   # b2
                + 2 * tm_ * E_pad * obytes        # output tile
                + (tm_ * E_pad * 4 if use_scratch else 0))

    budget = int(0.8 * vmem_cap)
    while footprint(tm_eff, th_eff) > budget and th_eff > 128:
        th_eff = max(128, _round_up(th_eff // 2, 128))
    while footprint(tm_eff, th_eff) > budget and tm_eff > 8:
        tm_eff = max(8, _round_up(tm_eff // 2, 8))

    tokens_pad = _round_up(tokens, tm_eff)
    H_pad = _round_up(_round_up(H, 128), th_eff)
    num_k = H_pad // th_eff
    grid = (tokens_pad // tm_eff, num_k)

    # MXU operands in compute dtype; biases stay f32.  Skip pads when aligned.
    x2d = _maybe_pad(x.reshape(tokens, E).astype(compute_dtype),
                     ((0, tokens_pad - tokens), (0, E_pad - E)))
    w1p = _maybe_pad(w1.astype(compute_dtype), ((0, E_pad - E), (0, H_pad - H)))
    w2p = _maybe_pad(w2.astype(compute_dtype), ((0, H_pad - H), (0, E_pad - E)))
    b1p = _maybe_pad(b1.astype(jnp.float32), ((0, H_pad - H),)).reshape(num_k, th_eff)
    b2p = _maybe_pad(b2.astype(jnp.float32), ((0, E_pad - E),)).reshape(1, E_pad)

    fp = footprint(tm_eff, th_eff)
    vmem_limit = min(int(0.9 * vmem_cap), max(32 << 20, int(1.25 * fp)))
    vmem_limit = max(vmem_limit, fp)

    weight_bytes = (w1p.size + w2p.size) * cbytes
    cost = pl.CostEstimate(
        flops=4 * tokens_pad * E_pad * H_pad,          # two matmuls
        transcendentals=tokens_pad * H_pad,            # GELU per hidden activation
        bytes_accessed=(x2d.size * cbytes
                        + grid[0] * weight_bytes       # weights re-streamed per row tile
                        + b1p.size * 4 + b2p.size * 4
                        + tokens_pad * E_pad * obytes),
    )

    scratch_shapes = ([pltpu.VMEM((tm_eff, E_pad), jnp.float32)]
                      if use_scratch else [])

    out2d = pl.pallas_call(
        partial(ffn_kernel, approximate_gelu=approximate_gelu),
        out_shape=jax.ShapeDtypeStruct((tokens_pad, E_pad), out_dtype),
        grid_spec=pltpu.PrefetchScalarGridSpec(
            num_scalar_prefetch=0,
            grid=grid,
            in_specs=[
                pl.BlockSpec((tm_eff, E_pad), lambda i, k: (i, 0)),   # x row tile
                pl.BlockSpec((E_pad, th_eff), lambda i, k: (0, k)),   # W1 slab
                pl.BlockSpec((num_k, th_eff), lambda i, k: (0, 0)),   # b1 (resident)
                pl.BlockSpec((th_eff, E_pad), lambda i, k: (k, 0)),   # W2 slab
                pl.BlockSpec((1, E_pad), lambda i, k: (0, 0)),        # b2 (resident)
            ],
            out_specs=pl.BlockSpec((tm_eff, E_pad), lambda i, k: (i, 0)),
            scratch_shapes=scratch_shapes,
        ),
        compiler_params=pltpu.CompilerParams(
            dimension_semantics=("parallel", "arbitrary"),
            vmem_limit_bytes=vmem_limit,
        ),
        cost_estimate=cost,
    )(x2d, w1p, b1p, w2p, b2p)

    return out2d[:tokens, :E].reshape(B, S, E)


def reference_ffn(x2d, w1, b1, w2, b2):
    hi = lax.Precision.HIGHEST
    h = jnp.dot(x2d, w1, precision=hi) + b1
    h = 0.5 * h * (1.0 + lax.erf(h * _INV_SQRT2))
    return jnp.dot(h, w2, precision=hi) + b2


def _make_params(key, E, H):
    kw1, kb1, kw2, kb2 = jax.random.split(key, 4)
    lim1 = 1.0 / math.sqrt(E)
    lim2 = 1.0 / math.sqrt(H)
    w1 = jax.random.uniform(kw1, (E, H), jnp.float32, -lim1, lim1)
    b1 = jax.random.uniform(kb1, (H,), jnp.float32, -lim1, lim1)
    w2 = jax.random.uniform(kw2, (H, E), jnp.float32, -lim2, lim2)
    b2 = jax.random.uniform(kb2, (E,), jnp.float32, -lim2, lim2)
    return w1, b1, w2, b2


if __name__ == "__main__":
    key = jax.random.PRNGKey(0)
    k1, k2, k3, k4 = jax.random.split(key, 4)

    # Test 1: toy config (cfg['emb_dim'] = 32 -> hidden = 128), exact f32 path.
    B, S, E = 2, 8, 32
    H = 4 * E
    x = jax.random.normal(k1, (B, S, E), dtype=jnp.float32)
    w1, b1, w2, b2 = _make_params(k2, E, H)
    out = jax.block_until_ready(
        feed_forward(x, w1, b1, w2, b2, compute_dtype=jnp.float32))
    ref = reference_ffn(x.reshape(-1, E), w1, b1, w2, b2).reshape(B, S, E)
    assert out.shape == (B, S, E)
    assert jnp.allclose(out, ref, atol=1e-4, rtol=1e-4), "mismatch (f32 path)"

    # Test 2: default bf16 MXU path; exercises row/channel padding, forced >=2
    # row tiles, and the k>1 hidden-accumulation path (th=128, H=256).
    B2, S2, E2 = 2, 12, 64
    H2 = 4 * E2
    x2 = jax.random.normal(k3, (B2, S2, E2), dtype=jnp.float32)
    w1b, b1b, w2b, b2b = _make_params(k4, E2, H2)
    out2 = jax.block_until_ready(feed_forward(x2, w1b, b1b, w2b, b2b, th=128))
    # Reference with the same bf16 operand rounding the kernel applies.
    xc = x2.reshape(-1, E2).astype(jnp.bfloat16).astype(jnp.float32)
    w1c = w1b.astype(jnp.bfloat16).astype(jnp.float32)
    w2c = w2b.astype(jnp.bfloat16).astype(jnp.float32)
    hr = jnp.dot(xc, w1c, precision=lax.Precision.HIGHEST) + b1b
    hr = 0.5 * hr * (1.0 + lax.erf(hr * _INV_SQRT2))
    hr = hr.astype(jnp.bfloat16).astype(jnp.float32)
    ref2 = (jnp.dot(hr, w2c, precision=lax.Precision.HIGHEST) + b2b).reshape(B2, S2, E2)
    assert out2.shape == (B2, S2, E2)
    assert jnp.allclose(out2, ref2, atol=2e-2, rtol=2e-2), "mismatch (bf16 path)"

    print("KERNEL_OK")
</pallas_src>

<mosaic_0001>
module attributes {stable_mosaic.version = 11 : i64} {
  func.func @ffn_kernel(%arg0: i32, %arg1: i32, %arg2: memref<8x128xf32, #tpu.memory_space<vmem>>, %arg3: memref<128x128xf32, #tpu.memory_space<vmem>>, %arg4: memref<1x128xf32, #tpu.memory_space<vmem>>, %arg5: memref<128x128xf32, #tpu.memory_space<vmem>>, %arg6: memref<1x128xf32, #tpu.memory_space<vmem>>, %arg7: memref<8x128xf32, #tpu.memory_space<vmem>>) attributes {dimension_semantics = [#tpu.dimension_semantics<parallel>, #tpu.dimension_semantics<arbitrary>], iteration_bounds = array<i64: 2, 1>, scalar_prefetch = 0 : i64, scratch_operands = 0 : i64, tpu.core_type = #tpu.core_type<tc>, window_params = [{transform_indices = @transform_0, window_bounds = array<i64: 8, 128>}, {transform_indices = @transform_1, window_bounds = array<i64: 128, 128>}, {pipeline_mode = #tpu.pipeline_mode<synchronous>, transform_indices = @transform_2, window_bounds = array<i64: 1, 128>}, {transform_indices = @transform_3, window_bounds = array<i64: 128, 128>}, {pipeline_mode = #tpu.pipeline_mode<synchronous>, transform_indices = @transform_4, window_bounds = array<i64: 1, 128>}, {transform_indices = @transform_5, window_bounds = array<i64: 8, 128>}]} {
    %c0_i32 = arith.constant 0 : i32
    %0 = arith.cmpi eq, %arg1, %c0_i32 : i32
    %1 = arith.extui %0 : i1 to i32
    %c0_i32_0 = arith.constant 0 : i32
    %2 = arith.cmpi ne, %1, %c0_i32_0 : i32
    scf.if %2 {
      %c0_15 = arith.constant 0 : index
      %c0_16 = arith.constant 0 : index
      %23 = vector.load %arg6[%c0_15, %c0_16] : memref<1x128xf32, #tpu.memory_space<vmem>>, vector<1x128xf32>
      %24 = vector.shape_cast %23 : vector<1x128xf32> to vector<1x128xf32>
      %25 = vector.broadcast %24 : vector<1x128xf32> to vector<8x128xf32>
      %c0_17 = arith.constant 0 : index
      %c0_18 = arith.constant 0 : index
      %26 = vector.load %arg7[%c0_17, %c0_18] : memref<8x128xf32, #tpu.memory_space<vmem>>, vector<8x128xf32>
      tpu.vector_store %arg7[%c0_17, %c0_18], %25 {strides = array<i32>} : memref<8x128xf32, #tpu.memory_space<vmem>>, vector<8x128xf32>,
    } else {
    }
    %c0 = arith.constant 0 : index
    %c0_1 = arith.constant 0 : index
    %3 = vector.load %arg2[%c0, %c0_1] : memref<8x128xf32, #tpu.memory_space<vmem>>, vector<8x128xf32>
    %c0_2 = arith.constant 0 : index
    %c0_3 = arith.constant 0 : index
    %4 = vector.load %arg3[%c0_2, %c0_3] : memref<128x128xf32, #tpu.memory_space<vmem>>, vector<128x128xf32>
    %cst = arith.constant dense<0.000000e+00> : vector<8x128xf32>
    %5 = tpu.matmul %3, %4, %cst {dimension_numbers = #tpu.dot_dimension_numbers<[1], [0], [0], [1], [0, 0, 1, 1], [], []>} : vector<8x128xf32>, vector<128x128xf32>, vector<8x128xf32> -> vector<8x128xf32>
    %6 = arith.index_cast %arg1 : i32 to index
    %c0_4 = arith.constant 0 : index
    %7 = vector.load %arg4[%6, %c0_4] : memref<1x128xf32, #tpu.memory_space<vmem>>, vector<1x128xf32>
    %8 = vector.broadcast %7 : vector<1x128xf32> to vector<8x128xf32>
    %9 = arith.addf %5, %8 : vector<8x128xf32>
    %cst_5 = arith.constant 5.000000e-01 : f32
    %10 = vector.broadcast %cst_5 : f32 to vector<8x128xf32>
    %11 = arith.mulf %10, %9 : vector<8x128xf32>
    %cst_6 = arith.constant 0.707106769 : f32
    %12 = vector.broadcast %cst_6 : f32 to vector<8x128xf32>
    %13 = arith.mulf %9, %12 : vector<8x128xf32>
    %14 = math.erf %13 : vector<8x128xf32>
    %cst_7 = arith.constant 1.000000e+00 : f32
    %15 = vector.broadcast %cst_7 : f32 to vector<8x128xf32>
    %16 = arith.addf %15, %14 : vector<8x128xf32>
    %17 = arith.mulf %11, %16 : vector<8x128xf32>
    %c0_8 = arith.constant 0 : index
    %c0_9 = arith.constant 0 : index
    %18 = vector.load %arg7[%c0_8, %c0_9] : memref<8x128xf32, #tpu.memory_space<vmem>>, vector<8x128xf32>
    %c0_10 = arith.constant 0 : index
    %c0_11 = arith.constant 0 : index
    %19 = vector.load %arg5[%c0_10, %c0_11] : memref<128x128xf32, #tpu.memory_space<vmem>>, vector<128x128xf32>
    %cst_12 = arith.constant dense<0.000000e+00> : vector<8x128xf32>
    %20 = tpu.matmul %17, %19, %cst_12 {dimension_numbers = #tpu.dot_dimension_numbers<[1], [0], [0], [1], [0, 0, 1, 1], [], []>} : vector<8x128xf32>, vector<128x128xf32>, vector<8x128xf32> -> vector<8x128xf32>
    %21 = arith.addf %18, %20 : vector<8x128xf32>
    %c0_13 = arith.constant 0 : index
    %c0_14 = arith.constant 0 : index
    %22 = vector.load %arg7[%c0_13, %c0_14] : memref<8x128xf32, #tpu.memory_space<vmem>>, vector<8x128xf32>
    tpu.vector_store %arg7[%c0_13, %c0_14], %21 {strides = array<i32>} : memref<8x128xf32, #tpu.memory_space<vmem>>, vector<8x128xf32>,
    return
  }
  func.func @transform_0(%arg0: i32, %arg1: i32) -> (i32, i32) {
    %c0_i32 = arith.constant 0 : i32
    %c0_i32_0 = arith.constant 0 : i32
    return %arg0, %c0_i32 : i32, i32
  }
  func.func @transform_1(%arg0: i32, %arg1: i32) -> (i32, i32) {
    %c0_i32 = arith.constant 0 : i32
    %c0_i32_0 = arith.constant 0 : i32
    return %c0_i32, %arg1 : i32, i32
  }
  func.func @transform_2(%arg0: i32, %arg1: i32) -> (i32, i32) {
    %c0_i32 = arith.constant 0 : i32
    %c0_i32_0 = arith.constant 0 : i32
    %c0_i32_1 = arith.constant 0 : i32
    return %c0_i32, %c0_i32_0 : i32, i32
  }
  func.func @transform_3(%arg0: i32, %arg1: i32) -> (i32, i32) {
    %c0_i32 = arith.constant 0 : i32
    %c0_i32_0 = arith.constant 0 : i32
    return %arg1, %c0_i32 : i32, i32
  }
  func.func @transform_4(%arg0: i32, %arg1: i32) -> (i32, i32) {
    %c0_i32 = arith.constant 0 : i32
    %c0_i32_0 = arith.constant 0 : i32
    %c0_i32_1 = arith.constant 0 : i32
    return %c0_i32, %c0_i32_0 : i32, i32
  }
  func.func @transform_5(%arg0: i32, %arg1: i32) -> (i32, i32) {
    %c0_i32 = arith.constant 0 : i32
    %c0_i32_0 = arith.constant 0 : i32
    return %arg0, %c0_i32 : i32, i32
  }
}

</mosaic_0001>

<bundles_post_ra>
// kernel: tpu_custom_call.1
= control target key start
LH: loop header
LB: loop body
LE: loop exit
PB: predicated region body
PF: predicated region fallthrough
CT: control target
= control target key end

     0   :  { %s1257_s0 = inlined_call_operand.hbm [shape: f32[16,128], index: 0, kind: input, shape index: {}]   ;;  %s1258_s1 = inlined_call_operand.hbm [shape: f32[128,128], index: 1, kind: input, shape index: {}]   ;;  %s1259_s2 = inlined_call_operand.vmem [shape: f32[1,128], index: 2, kind: input, shape index: {}]   ;;  %s1260_s3 = inlined_call_operand.hbm [shape: f32[128,128], index: 3, kind: input, shape index: {}]   ;;  %s1261_s4 = inlined_call_operand.vmem [shape: f32[1,128], index: 4, kind: input, shape index: {}]   ;;  %s1262_s5 = inlined_call_operand.hbm [shape: f32[16,128], index: 5, kind: output, shape index: {}]  }
   0x1   :  { %1266 = sst [smem:[#allocation12_spill]] %s1258_s1 }
   0x2   :  { %10 = vsyncpa [#allocation3], 0 }
   0x3   :  { %12 = vsyncpa [#allocation3 + $0x1], 0 }
   0x4   :  { %13 = vsyncpa [#allocation6], 0 }
   0x5   :  { %14 = vsyncpa [#allocation4], 0 }
   0x6   :  { %16 = vsyncpa [#allocation4 + $0x1], 0  ;;  %s1030_s18 = smov 0   ;;  %s1032_s19 = smov 0  }
   0x7   :  { %s1034_s20 = smov 0   ;;  %s1036_s21 = smov 0  }
   0x8   :  { %s1038_s22 = smov 0   ;;  %s1040_s23 = smov 0  }
   0x9 LB: > { %s614_s24 = sadd.s32 4294967295, %s990_s23   ;;  %s615_s25 = sadd.s32 4294967294, %s990_s23   ;;  %s990_s23 = sphi %s1040_s23, %s22_s23   ;;  %s986_s22 = sphi %s1038_s22, %s1284_s22   ;;  %s982_s21 = sphi %s1036_s21, %s1283_s21   ;;  %s978_s20 = sphi %s1034_s20, %s1282_s20   ;;  %s974_s19 = sphi %s1032_s19, %s1281_s19   ;;  %s970_s18 = sphi %s1030_s18, %s1280_s18  }
   0xa   : > { %p54_p0 = scmp.ne.s32.totalorder %s974_s19, %s970_s18  ;;  %p1064_p1 = scmp.eq.s32.totalorder %s614_s24, 0 }
   0xb   : > { %p1068_p2 = scmp.eq.s32.totalorder %s614_s24, 1  ;;  %p178_p3 = scmp.eq.s32.totalorder %s615_s25, 1 }
   0xc   : > { %s1267_s26 = scalar_select %p1064_p1, 1, 0 }
   0xd   : > { %p1074_p4 = por %p1064_p1, %p54_p0  ;;  %p616_p5 = scmp.ge.s32.totalorder %s990_s23, 1 }
   0xe   : > { %p1079_p6 = por %p178_p3, %p54_p0  ;;  %p185_p7 = scmp.lt.s32.totalorder %s990_s23, 3 }
   0xf   : > { %s1269_s28 = scalar_select %p1074_p4, 1, 0 }
  0x10   : > { %s1270_s29 = scalar_select %p1079_p6, 1, 0 }
  0x11   : > { %p1084_p8 = pnand %p616_p5, %p185_p7  ;;  %s992_s6 = smov [#allocation5]  }
  0x12   : > { %s199_s7 = sshll.u32 %s992_s6, 4  ;;  %s993_s9 = smov [#allocation7]   ;;  %s200_s7 = int_to_ptr.vmem [resolvable:$true] %s199_s7 }
  0x13   : > { %p749_p9 = pneg %p1084_p8  ;;  %s218_s10 = sshll.u32 %s993_s9, 4  ;;  %s219_s10 = int_to_ptr.vmem [resolvable:$true] %s218_s10 }
  0x14   : > { %s837_s11 = scalar_lea.vmem %s200_s7, 2048  ;;  %p845_p5 = scmp.lt.s32.totalorder %s200_s7, %s200_s7 }
  0x15   : > { %p1093_p11 = pnand %p749_p9, %p1064_p1  ;;  %p838_p13 = scmp.ne.s32.totalorder %s200_s7, %s837_s11 }
  0x16   : > { %p846_p7 = scmp.lt.s32.totalorder %s837_s11, %s837_s11 }
  0x17   : > { %p828_p12 = pneg %p1093_p11 }
  0x18   : > { %p847_p10 = por %p846_p7, %p845_p5 }
  0x19   : > { %p840_p0 = pnand %p838_p13, %p828_p12 }
  0x1b   : > { %p841_p3 = pneg %p840_p0 }
  0x1d   : > { %p848_p9 = pnand %p847_p10, %p841_p3 }
  0x1f   : > { %851 = shalt.err (!%p848_p9)
}
  0x20   : > { %s994_s12 = smov 128   ;;  %s995_s13 = smov 8  }
  0x21   : > { %s1273_s1 = sld [smem:[#allocation12_spill]]  ;;  %s863_s16 = scalar_lea.vmem %s219_s10, 2048 }
  0x22   : > { %p864_p6 = scmp.ne.s32.totalorder %s219_s10, %s863_s16  ;;  %p871_p1 = scmp.lt.s32.totalorder %s219_s10, %s219_s10 }
  0x23   : > { %p872_p4 = scmp.lt.s32.totalorder %s863_s16, %s863_s16 }
  0x24   : > { %p866_p13 = pnand %p864_p6, %p828_p12 }
  0x25   : > { %p873_p5 = por %p872_p4, %p871_p1 }
  0x26   : > { %p867_p0 = pneg %p866_p13 }
  0x27   : > { %752 = dma.hbm_to_vmem [thread:$0]  (!%p1093_p11), %s1273_s1, 2048, %s200_s7, [#allocation6], %s994_s12, %s994_s12, %s995_s13  }
  0x28   : > { %p874_p10 = pnand %p873_p5, %p867_p0 }
  0x2a   : > { %877 = shalt.err (!%p874_p10)
}
  0x2b   : > { %755 = dma.hbm_to_vmem [thread:$0]  (!%p1093_p11), %s1260_s3, 2048, %s219_s10, [#allocation6], %s994_s12, %s994_s12, %s995_s13  }
  0x2c   : > { %s34_s25 = sadd.s32 1, %s986_s22  ;;  %s41_s6 = sadd.s32 1, %s978_s20 }
  0x2d   : > { %p36_p1 = scmp.ge.s32.totalorder %s34_s25, 2  ;;  %p48_p4 = scmp.ne.s32.totalorder %s978_s20, %s974_s19 }
  0x2e   : > { %p49_p6 = scmp.eq.s32.totalorder %s990_s23, 0  ;;  %p766_p12 = scmp.lt.s32.totalorder %s990_s23, 2 }
  0x2f   : > { %s1286_s25 = smov (%p36_p1, %s34_s25), 0  ;;  %p1125_p7 = por %p1068_p2, %p48_p4 }
  0x30   : > { %p50_p3 = por %p49_p6, %p48_p4  ;;  %s38_s8 = ssub.s32 %s986_s22, %s1286_s25 }
  0x31   : > { %s235_s9 = sand.u32 1, %s978_s20   ;;  %p39_p9 = scmp.eq.s32.totalorder %s38_s8, 0 }
  0x32   : > { %s620_s10 = sshll.u32 %s235_s9, 3  ;;  %s621_s11 = sshll.u32 %s986_s22, 7 }
  0x33   : > { %s1134_s12 = scalar_select %p39_p9, %s978_s20, %s41_s6  }
  0x34   : > { %s244_s15 = scalar_lea.hbm %s1257_s0, %s621_s11  ;;  %s239_s16 = scalar_lea.vmem [#allocation2], %s620_s10 }
  0x35   : > { %s246_s17 = sshll.u32 %s239_s16, 4  ;;  %p1141_p11 = pnand %p766_p12, %p50_p3  ;;  %s247_s17 = int_to_ptr.vmem [resolvable:$true] %s246_s17 }
  0x36   : > { %s236_s24 = scalar_lea.sflag [#allocation3], %s235_s9  ;;  %s891_s8 = scalar_lea.vmem %s247_s17, 128 }
  0x37   : > { %p880_p2 = pneg %p1141_p11  ;;  %p892_p13 = scmp.ne.s32.totalorder %s247_s17, %s891_s8 }
  0x38   : > { %s996_s6 = smov [#allocation2]  }
  0x39   : > { %p894_p0 = pnand %p892_p13, %p880_p2  ;;  %s896_s1 = sshll.u32 %s996_s6, 4  ;;  %s897_s1 = int_to_ptr.vmem [resolvable:$false] %s896_s1 }
  0x3a   : > { %s898_s11 = scalar_lea.vmem %s897_s1, 256  ;;  %p899_p10 = scmp.lt.s32.totalorder %s247_s17, %s897_s1 }
  0x3b   : > { %p895_p5 = pneg %p894_p0  ;;  %p900_p1 = scmp.lt.s32.totalorder %s898_s11, %s891_s8 }
  0x3d   : > { %p901_p4 = por %p900_p1, %p899_p10 }
  0x3f   : > { %p902_p6 = pnand %p901_p4, %p895_p5 }
  0x41   : > { %905 = shalt.err (!%p902_p6)
}
  0x42   : > { %759 = dma.hbm_to_vmem [thread:$0]  (!%p1141_p11), %s244_s15, 128, %s247_s17, %s236_s24  }
  0x43   : > { %255 = sbr.rel (%p1084_p8) target bundleno = 533 (0x215), region = 40  ;;  %s1152_s9 = sand.u32 (!%p1084_p8), 1, %s974_s19  }
  0x44   : > { %s623_s10 = sshll.u32 (!%p1084_p8), %s1152_s9, 3  ;;  %s258_s13 = scalar_lea.sflag (!%p1084_p8), [#allocation3], %s1152_s9 }
  0x45   : > { %s1158_s1 = scalar_lea.vmem (!%p1084_p8), [#allocation2], %s623_s10  ;;  %p1276_p12 = scmp.ne.s32.totalorder (!%p1084_p8), %s1269_s28, 0 }
  0x48   : > { %957 = dma.done.wait (%p1276_p12), %s258_s13, 128  }
  0x49   : > { %959 = vsyncadd (%p1276_p12), %s258_s13, 4294967168  ;;  %p1277_p3 = scmp.ne.s32.totalorder %s1267_s26, 0 }
  0x4b   : > { %961 = dma.done.wait (%p1277_p3), [#allocation6], 4096  }
  0x4c   : > { %963 = vsyncadd (%p1277_p3), [#allocation6], 4294963200  ;;  %v997_v0 = vmov 0.0   ;;  %vm998_vm0 = vmmov 0   ;;  %v325_v1 = vld [vmem:[#allocation5 + $0x78] sm:$0xff]  ;;  %v324_v2 = vld [vmem:[#allocation5 + $0x70] sm:$0xff] }
  0x4d   : > { %667 = vmatprep.subr.mxu0 %v997_v0  ;;  %699 = vmatprep.mubr.msk.f32.mxu0 %vm998_vm0, %v997_v0  ;;  %v323_v3 = vld [vmem:[#allocation5 + $0x68] sm:$0xff]  ;;  %v322_v4 = vld [vmem:[#allocation5 + $0x60] sm:$0xff]  ;;  %v425_v5 = vld [vmem:[#allocation7 + $0x78] sm:$0xff]  ;;  %s630_s15 = sshll.u32 %s982_s21, 7  ;;  %s295_s16 = scalar_lea.vmem [#allocation8], %s623_s10 }
  0x4e   : > { %702 = vmatprep.subr.mxu1 %v997_v0  ;;  %734 = vmatprep.mubr.msk.f32.mxu1 %vm998_vm0, %v997_v0  ;;  %v321_v6 = vld [vmem:[#allocation5 + $0x58] sm:$0xff]  ;;  %v424_v7 = vld [vmem:[#allocation7 + $0x70] sm:$0xff]  ;;  %v423_v8 = vld [vmem:[#allocation7 + $0x68] sm:$0xff]  ;;  %s512_s17 = sshll.u32 %s295_s16, 4  ;;  %s1215_s8 = scalar_lea.hbm %s1262_s5, %s630_s15  ;;  %s513_s17 = int_to_ptr.vmem [resolvable:$true] %s512_s17 }
  0x4f   : > { %668 = vmatpush3.msra.mxu0 %v325_v1  ;;  %703 = vmatpush3.msra.mxu1 %v425_v5  ;;  %v320_v9 = vld [vmem:[#allocation5 + $0x50] sm:$0xff]  ;;  %v422_v10 = vld [vmem:[#allocation7 + $0x60] sm:$0xff]  ;;  %v319_v11 = vld [vmem:[#allocation5 + $0x48] sm:$0xff]  ;;  %s499_s6 = scalar_lea.sflag [#allocation4], %s1152_s9  ;;  %s906_s11 = scalar_lea.vmem %s513_s17, 128 }
  0x50   : > { %669 = vmatprep.subr.mxu0 %v997_v0  ;;  %704 = vmatprep.subr.mxu1 %v997_v0  ;;  %v318_v12 = vld [vmem:[#allocation5 + $0x40] sm:$0xff]  ;;  %v317_v13 = vld [vmem:[#allocation5 + $0x38] sm:$0xff]  ;;  %v316_v14 = vld [vmem:[#allocation5 + $0x30] sm:$0xff]  ;;  %p907_p8 = scmp.ne.s32.totalorder %s513_s17, %s906_s11  ;;  %s999_s21 = smov [#allocation8]  }
  0x51   : > { %670 = vmatpush3.msra.mxu0 %v324_v2  ;;  %705 = vmatpush3.msra.mxu1 %v424_v7  ;;  %v315_v15 = vld [vmem:[#allocation5 + $0x28] sm:$0xff]  ;;  %v314_v16 = vld [vmem:[#allocation5 + $0x20] sm:$0xff]  ;;  %v313_v17 = vld [vmem:[#allocation5 + $0x18] sm:$0xff]  ;;  %s910_s13 = sshll.u32 %s999_s21, 4  ;;  %s911_s13 = int_to_ptr.vmem [resolvable:$false] %s910_s13 }
  0x52   : > { %671 = vmatprep.subr.mxu0 %v997_v0  ;;  %706 = vmatprep.subr.mxu1 %v997_v0  ;;  %v312_v18 = vld [vmem:[#allocation5 + $0x10] sm:$0xff]  ;;  %v311_v19 = vld [vmem:[#allocation5 + $0x8] sm:$0xff]  ;;  %v310_v20 = vld [vmem:[#allocation5] sm:$0xff]  ;;  %p908_p9 = pnand %p907_p8, %p1125_p7  ;;  %s912_s10 = scalar_lea.vmem %s911_s13, 256 }
  0x53   : > { %672 = vmatpush3.msra.mxu0 %v323_v3  ;;  %707 = vmatpush3.msra.mxu1 %v423_v8  ;;  %v309_v21 = vld [vmem:[%s1158_s1] sm:$0xff]  ;;  %v419_v24 = vld [vmem:[#allocation7 + $0x48] sm:$0xff]  ;;  %v418_v25 = vld [vmem:[#allocation7 + $0x40] sm:$0xff]  ;;  %p913_p2 = scmp.lt.s32.totalorder %s513_s17, %s911_s13  ;;  %p914_p13 = scmp.lt.s32.totalorder %s912_s10, %s906_s11 }
  0x54   : > { %673 = vmatprep.subr.mxu0 %v997_v0  ;;  %708 = vmatprep.subr.mxu1 %v997_v0  ;;  %v421_v22 = vld [vmem:[#allocation7 + $0x58] sm:$0xff]  ;;  %v420_v23 = vld [vmem:[#allocation7 + $0x50] sm:$0xff]  ;;  %v415_v28 = vld [vmem:[#allocation7 + $0x28] sm:$0xff]  ;;  %p909_p11 = pneg %p908_p9 }
  0x55   : > { %674 = vmatpush3.msra.mxu0 %v322_v4  ;;  %709 = vmatpush3.msra.mxu1 %v422_v10  ;;  %v417_v26 = vld [vmem:[#allocation7 + $0x38] sm:$0xff]  ;;  %v416_v27 = vld [vmem:[#allocation7 + $0x30] sm:$0xff]  ;;  %v414_v29 = vld [vmem:[#allocation7 + $0x20] sm:$0xff]  ;;  %p915_p0 = por %p914_p13, %p913_p2 }
  0x56   : > { %675 = vmatprep.subr.mxu0 %v997_v0  ;;  %710 = vmatprep.subr.mxu1 %v997_v0  ;;  %v413_v30 = vld [vmem:[#allocation7 + $0x18] sm:$0xff]  ;;  %v412_v31 = vld [vmem:[#allocation7 + $0x10] sm:$0xff]  ;;  %v411_v32 = vld [vmem:[#allocation7 + $0x8] sm:$0xff] }
  0x57   : > { %676 = vmatpush3.msra.mxu0 %v321_v6  ;;  %711 = vmatpush3.msra.mxu1 %v421_v22  ;;  %v410_v33 = vld [vmem:[#allocation7] sm:$0xff]  ;;  %v628_v34 = vld [vmem:[%s1259_s2] ss:$0 sm:$0xff]  ;;  %p916_p5 = pnand %p915_p0, %p909_p11 }
  0x58   : > { %677 = vmatprep.subr.mxu0 %v997_v0  ;;  %712 = vmatprep.subr.mxu1 %v997_v0  ;;  %v627_v43 = vld [vmem:[%s1261_s4] ss:$0 sm:$0xff] }
  0x59   : > { %678 = vmatpush3.msra.mxu0 %v320_v9  ;;  %713 = vmatpush3.msra.mxu1 %v420_v23 }
  0x5a   : > { %679 = vmatprep.subr.mxu0 %v997_v0  ;;  %714 = vmatprep.subr.mxu1 %v997_v0 }
  0x5b   : > { %680 = vmatpush3.msra.mxu0 %v319_v11  ;;  %715 = vmatpush3.msra.mxu1 %v419_v24 }
  0x5c   : > { %681 = vmatprep.subr.mxu0 %v997_v0  ;;  %716 = vmatprep.subr.mxu1 %v997_v0 }
  0x5d   : > { %682 = vmatpush3.msra.mxu0 %v318_v12  ;;  %717 = vmatpush3.msra.mxu1 %v418_v25 }
  0x5e   : > { %683 = vmatprep.subr.mxu0 %v997_v0  ;;  %718 = vmatprep.subr.mxu1 %v997_v0 }
  0x5f   : > { %684 = vmatpush3.msra.mxu0 %v317_v13  ;;  %719 = vmatpush3.msra.mxu1 %v417_v26 }
  0x60   : > { %685 = vmatprep.subr.mxu0 %v997_v0  ;;  %720 = vmatprep.subr.mxu1 %v997_v0 }
  0x61   : > { %686 = vmatpush3.msra.mxu0 %v316_v14  ;;  %721 = vmatpush3.msra.mxu1 %v416_v27 }
  0x62   : > { %687 = vmatprep.subr.mxu0 %v997_v0  ;;  %722 = vmatprep.subr.mxu1 %v997_v0 }
  0x63   : > { %688 = vmatpush3.msra.mxu0 %v315_v15  ;;  %723 = vmatpush3.msra.mxu1 %v415_v28 }
  0x64   : > { %689 = vmatprep.subr.mxu0 %v997_v0  ;;  %724 = vmatprep.subr.mxu1 %v997_v0 }
  0x65   : > { %690 = vmatpush3.msra.mxu0 %v314_v16  ;;  %725 = vmatpush3.msra.mxu1 %v414_v29 }
  0x66   : > { %691 = vmatprep.subr.mxu0 %v997_v0  ;;  %726 = vmatprep.subr.mxu1 %v997_v0 }
  0x67   : > { %692 = vmatpush3.msra.mxu0 %v313_v17  ;;  %727 = vmatpush3.msra.mxu1 %v413_v30 }
  0x68   : > { %693 = vmatprep.subr.mxu0 %v997_v0  ;;  %728 = vmatprep.subr.mxu1 %v997_v0 }
  0x69   : > { %694 = vmatpush3.msra.mxu0 %v312_v18  ;;  %729 = vmatpush3.msra.mxu1 %v412_v31 }
  0x6a   : > { %695 = vmatprep.subr.mxu0 %v997_v0  ;;  %730 = vmatprep.subr.mxu1 %v997_v0 }
  0x6b   : > { %696 = vmatpush3.msra.mxu0 %v311_v19  ;;  %731 = vmatpush3.msra.mxu1 %v411_v32 }
  0x6c   : > { %697 = vmatprep.subr.mxu0 %v997_v0  ;;  %732 = vmatprep.subr.mxu1 %v997_v0 }
  0x6d   : > { %698 = vmatpush3.msra.mxu0 %v310_v20  ;;  %733 = vmatpush3.msra.mxu1 %v410_v33 }
  0x6e   : > { %700 = vmatmul.mubr.f32.vlgmr.msra.gmra.mxu0 %v309_v21 }
 0x12e   : > { %v400_v35 = vpop.f32.mrf.mxu0 }
 0x12f   : > { %v401_v36 = vadd.f32 %v628_v34, %v400_v35 }
 0x130   : > { %v701_v37 = vpop.f32.mrf.mxu0 }
 0x131   : > { %v405_v38 = vmul.f32 0.70710677, %v401_v36  ;;  %v404_v40 = vmul.f32 0.5, %v401_v36 }
 0x133   : > { %824 = verf.f32 %v405_v38 }
 0x140   : > { %v825_v39 = vpop.eup %824 }
 0x141   : > { %v407_v41 = vadd.f32 1.0, %v825_v39 }
 0x143   : > { %v408_v42 = vmul.f32 %v407_v41, %v404_v40 }
 0x145   : > { %735 = vmatmul.mubr.f32.vlgmr.msra.gmra.mxu1 %v408_v42 }
 0x205   : > { %v492_v44 = vpop.f32.mrf.mxu1 }
 0x206   : > { %v496_v45 = vadd.f32 %v627_v43, %v492_v44 }
 0x207   : > { %v736_v46 = vpop.f32.mrf.mxu1 }
 0x208   : > { %497 = vst [vmem:[%s295_s16] sm:$0xff] %v496_v45 }
 0x209   : > { %919 = shalt.err (!%p916_p5)
}
 0x20a   : > { %s920_s1 = scalar_lea.hbm %s1215_s8, 128  ;;  %s924_s28 = scalar_lea.hbm %s1262_s5, 256 }
 0x20b   : > { %p921_p10 = scmp.ne.s32.totalorder %s1215_s8, %s920_s1  ;;  %p925_p6 = scmp.lt.s32.totalorder %s1215_s8, %s1262_s5 }
 0x20c   : > { %p926_p12 = scmp.lt.s32.totalorder %s924_s28, %s920_s1 }
 0x20d   : > { %p922_p1 = pnand %p921_p10, %p1125_p7 }
 0x20e   : > { %p927_p3 = por %p926_p12, %p925_p6 }
 0x20f   : > { %p923_p4 = pneg %p922_p1 }
 0x211   : > { %p928_p8 = pnand %p927_p3, %p923_p4 }
 0x213   : > { %931 = shalt.err (!%p928_p8)
}
 0x214   : > { %747 = dma.vmem_to_hbm [thread:$0]  (%p1125_p7), %s513_s17, 128, %s1215_s8, %s499_s6  }
 0x215 PF: > { %s524_s15 = sand.u32 1, %s970_s18   ;;  %p1278_p9 = scmp.ne.s32.totalorder %s1270_s29, 0 }
 0x216   : > { %p1279_p11 = scmp.ge.s32.totalorder %s990_s23, 2  ;;  %s525_s16 = scalar_lea.sflag [#allocation4], %s524_s15 }
 0x218   : > { %p761_p2 = pnand %p1279_p11, %p1278_p9 }
 0x21a   : > { %p762_p13 = pneg %p761_p2 }
 0x21c   : > { %965 = dma.done.wait (%p762_p13), %s525_s16, 128  }
 0x21d   : > { %967 = vsyncadd (%p762_p13), %s525_s16, 4294967168  ;;  %s22_s23 = sadd.s32 1, %s990_s23   ;;  %s1280_s18 = smov %s974_s19 }
 0x21e   : > { %p19_p0 = scmp.ge.s32.totalorder %s22_s23, 4   ;;  %s1281_s19 = smov %s978_s20 }
 0x21f   : > { %s1282_s20 = smov %s1134_s12  ;;  %s1283_s21 = smov %s986_s22 }
 0x220   : > { %s1284_s22 = smov %s1286_s25  ;;  %21 = sbr.rel (!%p19_p0) target bundleno = 9 (0x9), region = 100 }
 0x225   :  { %530 = vsyncpa [#allocation3], 1 }
 0x226   :  { %532 = vsyncpa [#allocation3 + $0x1], 1 }
 0x227   :  { %533 = vsyncpa [#allocation6], 1 }
 0x228   :  { %534 = vsyncpa [#allocation4], 1 }
 0x229   :  { %536 = vsyncpa [#allocation4 + $0x1], 1 }

</bundles_post_ra>
